<compile_context>
chip_gen: v5e
topology: v5e:2x2
jax: 0.10.0
libtpu: 0.0.40
codegen_flags: <defaults>
</compile_context>

<pallas_src>
import jax
import jax.numpy as jnp
from jax.experimental import pallas as pl
from jax.experimental.pallas import tpu as pltpu

# ----------------------------- configuration --------------------------------
B, D, H, W = 2, 4, 8, 8
DIM = 8
N_DIV = 4
CC = DIM // N_DIV              # dim_conv3 = 2
MLP_RATIO = 2.0
HIDDEN = int(DIM * MLP_RATIO)  # 16
KC = 27 * CC                   # im2col width of the 3x3x3 partial conv (54)
KINB = KC + (DIM - CC) + 1     # fused GEMM width: [im2col | untouched | bias-1] (61)
EPS = 1e-5
TN = 512                       # voxel-columns per grid step: whole problem in one
                               # VMEM-resident step on all generations (incl. v7x)
COMPUTE_DTYPE = jnp.bfloat16   # boundary cast for xin + weights; f32 accumulation.
                               # Use jnp.float32 for strict 1e-4 reference matching.


# ------------------------------- kernel -------------------------------------
def mlp_block_kernel(xin_ref, x_ref, wstack_ref, w2_ref, out_ref, xb_ref):
    # Channels-first, voxels on lanes (last dim = TN): every vector load/store is
    # a full-width, unmasked vreg access.
    xin = xin_ref[...]                                   # (KINB, TN) [im2col|untouched|1]

    # One MXU push computes BOTH spatial_mixing(x) and the MLP hidden layer
    # (conv, pass-through, 1x1x1 conv, BN scale and BN shift all folded into the
    # stacked weight).
    y = jnp.dot(wstack_ref[...], xin,
                preferred_element_type=jnp.float32)      # (DIM+HIDDEN, TN) f32

    xb = y[:DIM, :]                                      # spatial_mixing(x)    (8, TN)
    h = jnp.maximum(y[DIM:, :], 0.0)                     # BN(+shift) -> ReLU  (16, TN)

    # 1x1x1 conv back to DIM channels + residual add (shortcut kept in f32).
    out = x_ref[...] + jnp.dot(w2_ref[...], h.astype(w2_ref.dtype),
                               preferred_element_type=jnp.float32)

    out_ref[...] = out
    xb_ref[...] = xb


# -------------------------- one-time weight folding --------------------------
def prepare_params(w_conv, w1, w2, bn_gamma, bn_beta, bn_mean, bn_var,
                   compute_dtype=COMPUTE_DTYPE):
    """Init-time precompute (hoisted off the per-forward path).

    Returns (wstack, w2_t):
      wstack: (DIM+HIDDEN, KINB)  rows 0:DIM   -> spatial_mixing (conv + identity)
                                  rows DIM:    -> MLP hidden (conv & eval-BN folded,
                                                 BN shift as the bias column)
      w2_t:   (DIM, HIDDEN)       second 1x1x1 conv, transposed.
    """
    # (kd,kh,kw,ci,co) -> (27*CC, CC): tap-major / ci-minor, in lockstep with the
    # im2col row order built in mlp_block_pallas (keep the allclose test if either
    # side is refactored).
    wc = w_conv.reshape(KC, CC).astype(jnp.float32)

    inv_std = bn_gamma / jnp.sqrt(bn_var + EPS)
    shift = bn_beta - bn_mean * inv_std                  # eval-BN shift   (HIDDEN,)
    w1s = w1 * inv_std[None, :]                          # eval-BN scale folded into W1

    # spatial_mixing rows:  [ wc^T | 0 | 0 ]   conv channels
    #                       [  0   | I | 0 ]   untouched pass-through channels
    wxb = jnp.zeros((DIM, KINB), jnp.float32)
    wxb = wxb.at[:CC, :KC].set(wc.T)
    wxb = wxb.at[CC:, KC:KC + (DIM - CC)].set(jnp.eye(DIM - CC, dtype=jnp.float32))

    # MLP-hidden rows: conv folded into W1 (xcol @ (wc @ W1s)), untouched part of
    # W1s, and the BN shift as the bias column.
    w1f = jnp.concatenate([wc @ w1s[:CC], w1s[CC:], shift[None, :]], axis=0).T  # (HIDDEN, KINB)

    wstack = jnp.concatenate([wxb, w1f], axis=0).astype(compute_dtype)  # (DIM+HIDDEN, KINB)
    w2_t = w2.T.astype(compute_dtype)                                   # (DIM, HIDDEN)
    return wstack, w2_t


# ------------------------------- forward ------------------------------------
def mlp_block_pallas(x, wstack, w2_t, *, channels_first_out=False):
    """x: [B, D, H, W, DIM] (NDHWC). Returns (out, xb) in the same layout.

    With channels_first_out=True, outputs stay in the kernel's lane-dense (DIM, n)
    layout so a chained MLPBlock can consume them without re-transposing.
    """
    b, d, h, w, dim = x.shape
    n = b * d * h * w

    # ---- glue (XLA, fused under jit): im2col built directly lane-dense --------
    x_cf = jnp.moveaxis(x, -1, 0).reshape(dim, n).astype(jnp.float32)    # (DIM, n)
    xc = jnp.moveaxis(x[..., :CC], -1, 0)                                # (CC, B, D, H, W)
    xp = jnp.pad(xc, ((0, 0), (0, 0), (1, 1), (1, 1), (1, 1)))
    taps = []
    for kd in range(3):
        for kh in range(3):
            for kw in range(3):
                taps.append(xp[:, :, kd:kd + d, kh:kh + h, kw:kw + w].reshape(CC, n))
    xin_t = jnp.concatenate(
        taps + [x_cf[CC:], jnp.ones((1, n), jnp.float32)], axis=0)       # (KINB, n)
    xin_t = xin_t.astype(wstack.dtype)                                   # bf16 boundary cast

    # ---- voxel-tiling guard: pad n up to a multiple of TN (no-op at n=512) ----
    n_pad = pl.cdiv(n, TN) * TN
    if n_pad != n:
        xin_t = jnp.pad(xin_t, ((0, 0), (0, n_pad - n)))
        x_cf = jnp.pad(x_cf, ((0, 0), (0, n_pad - n)))

    out_t, xb_t = pl.pallas_call(
        mlp_block_kernel,
        out_shape=(jax.ShapeDtypeStruct((dim, n_pad), jnp.float32),
                   jax.ShapeDtypeStruct((dim, n_pad), jnp.float32)),
        grid=(n_pad // TN,),
        in_specs=[
            pl.BlockSpec((KINB, TN), lambda i: (0, i)),          # [im2col|untouched|1]
            pl.BlockSpec((dim, TN), lambda i: (0, i)),           # f32 shortcut
            pl.BlockSpec((DIM + HIDDEN, KINB), lambda i: (0, 0)),  # stacked weight
            pl.BlockSpec((dim, HIDDEN), lambda i: (0, 0)),       # W2^T
        ],
        out_specs=(pl.BlockSpec((dim, TN), lambda i: (0, i)),
                   pl.BlockSpec((dim, TN), lambda i: (0, i))),
        compiler_params=pltpu.CompilerParams(
            dimension_semantics=("parallel",)),
    )(xin_t, x_cf, wstack, w2_t)

    if channels_first_out:
        return out_t[:, :n], xb_t[:, :n]

    out = jnp.moveaxis(out_t[:, :n].reshape(dim, b, d, h, w), 0, -1)
    xb = jnp.moveaxis(xb_t[:, :n].reshape(dim, b, d, h, w), 0, -1)
    return out, xb


# ------------------------------ reference -----------------------------------
def mlp_block_reference(x, w_conv, w1, w2, bn_gamma, bn_beta, bn_mean, bn_var):
    xc = x[..., :CC]
    conv = jax.lax.conv_general_dilated(
        xc, w_conv, window_strides=(1, 1, 1), padding="SAME",
        dimension_numbers=("NDHWC", "DHWIO", "NDHWC"))
    xb = jnp.concatenate([conv, x[..., CC:]], axis=-1)
    h = jnp.einsum("bdhwc,ck->bdhwk", xb, w1)
    h = (h - bn_mean) / jnp.sqrt(bn_var + EPS) * bn_gamma + bn_beta
    h = jnp.maximum(h, 0.0)
    out = x + jnp.einsum("bdhwk,kc->bdhwc", h, w2)
    return out, xb


# -------------------------------- main ---------------------------------------
if __name__ == "__main__":
    key = jax.random.PRNGKey(0)
    k_x, k_wc, k_w1, k_w2, k_g, k_b, k_m, k_v = jax.random.split(key, 8)

    # input (channels-last NDHWC; NCDHW equivalent would be [B, DIM, D, H, W])
    x = jax.random.normal(k_x, (B, D, H, W, DIM), jnp.float32)

    # deterministic parameter init (synthetic; shapes follow the module __init__)
    w_conv = 0.1 * jax.random.normal(k_wc, (3, 3, 3, CC, CC), jnp.float32)  # Conv3d(CC,CC,3,pad=1,no bias)
    w1 = 0.1 * jax.random.normal(k_w1, (DIM, HIDDEN), jnp.float32)          # Conv3d(DIM,HIDDEN,1,no bias)
    w2 = 0.1 * jax.random.normal(k_w2, (HIDDEN, DIM), jnp.float32)          # Conv3d(HIDDEN,DIM,1,no bias)
    bn_gamma = 1.0 + 0.1 * jax.random.normal(k_g, (HIDDEN,), jnp.float32)   # BatchNorm3d(HIDDEN), eval mode
    bn_beta = 0.1 * jax.random.normal(k_b, (HIDDEN,), jnp.float32)
    bn_mean = 0.1 * jax.random.normal(k_m, (HIDDEN,), jnp.float32)
    bn_var = 1.0 + 0.1 * jnp.abs(jax.random.normal(k_v, (HIDDEN,), jnp.float32))

    # Init-time weight folding (off the steady-state forward path).
    wstack, w2_t = prepare_params(w_conv, w1, w2, bn_gamma, bn_beta, bn_mean, bn_var)

    fwd = jax.jit(mlp_block_pallas)
    out, xb = fwd(x, wstack, w2_t)
    jax.block_until_ready((out, xb))

    out_ref, xb_ref = mlp_block_reference(x, w_conv, w1, w2, bn_gamma, bn_beta,
                                          bn_mean, bn_var)

    # bf16 inputs/weights with f32 MXU accumulation -> bf16-appropriate tolerance;
    # flip COMPUTE_DTYPE to jnp.float32 above for strict 1e-4 matching.
    tol = 2e-2 if COMPUTE_DTYPE == jnp.bfloat16 else 1e-4
    assert jnp.allclose(xb, xb_ref, rtol=tol, atol=tol), "xb mismatch"
    assert jnp.allclose(out, out_ref, rtol=tol, atol=tol), "out mismatch"

    # TODO(synk): DropPath (stochastic depth) is Identity here (drop_path=0.0);
    # the layer_scale / double_input branches are not taken with this config.
    print("KERNEL_OK")
</pallas_src>

<mosaic_0001>
module attributes {stable_mosaic.version = 11 : i64} {
  func.func @mlp_block_kernel(%arg0: i32, %arg1: memref<61x512xbf16, #tpu.memory_space<vmem>>, %arg2: memref<8x512xf32, #tpu.memory_space<vmem>>, %arg3: memref<24x61xbf16, #tpu.memory_space<vmem>>, %arg4: memref<8x16xbf16, #tpu.memory_space<vmem>>, %arg5: memref<8x512xf32, #tpu.memory_space<vmem>>, %arg6: memref<8x512xf32, #tpu.memory_space<vmem>>) attributes {dimension_semantics = [#tpu.dimension_semantics<parallel>], iteration_bounds = array<i64: 1>, scalar_prefetch = 0 : i64, scratch_operands = 0 : i64, tpu.core_type = #tpu.core_type<tc>, window_params = [{transform_indices = @transform_0, window_bounds = array<i64: 61, 512>}, {transform_indices = @transform_1, window_bounds = array<i64: 8, 512>}, {pipeline_mode = #tpu.pipeline_mode<synchronous>, transform_indices = @transform_2, window_bounds = array<i64: 24, 61>}, {pipeline_mode = #tpu.pipeline_mode<synchronous>, transform_indices = @transform_3, window_bounds = array<i64: 8, 16>}, {transform_indices = @transform_4, window_bounds = array<i64: 8, 512>}, {transform_indices = @transform_5, window_bounds = array<i64: 8, 512>}]} {
    %c0 = arith.constant 0 : index
    %c0_0 = arith.constant 0 : index
    %0 = vector.load %arg1[%c0, %c0_0] : memref<61x512xbf16, #tpu.memory_space<vmem>>, vector<61x512xbf16>
    %c0_1 = arith.constant 0 : index
    %c0_2 = arith.constant 0 : index
    %1 = vector.load %arg3[%c0_1, %c0_2] : memref<24x61xbf16, #tpu.memory_space<vmem>>, vector<24x61xbf16>
    %cst = arith.constant dense<0.000000e+00> : vector<24x512xf32>
    %2 = tpu.matmul %1, %0, %cst {dimension_numbers = #tpu.dot_dimension_numbers<[1], [0], [0], [1], [0, 0, 1, 1], [], []>} : vector<24x61xbf16>, vector<61x512xbf16>, vector<24x512xf32> -> vector<24x512xf32>
    %3 = vector.extract_strided_slice %2 {offsets = [0, 0], sizes = [8, 512], strides = [1, 1]} : vector<24x512xf32> to vector<8x512xf32>
    %4 = vector.extract_strided_slice %2 {offsets = [8, 0], sizes = [16, 512], strides = [1, 1]} : vector<24x512xf32> to vector<16x512xf32>
    %cst_3 = arith.constant 0.000000e+00 : f32
    %5 = vector.broadcast %cst_3 : f32 to vector<16x512xf32>
    %6 = arith.maximumf %4, %5 : vector<16x512xf32>
    %c0_4 = arith.constant 0 : index
    %c0_5 = arith.constant 0 : index
    %7 = vector.load %arg2[%c0_4, %c0_5] : memref<8x512xf32, #tpu.memory_space<vmem>>, vector<8x512xf32>
    %c0_6 = arith.constant 0 : index
    %c0_7 = arith.constant 0 : index
    %8 = vector.load %arg4[%c0_6, %c0_7] : memref<8x16xbf16, #tpu.memory_space<vmem>>, vector<8x16xbf16>
    %9 = arith.truncf %6 : vector<16x512xf32> to vector<16x512xbf16>
    %cst_8 = arith.constant dense<0.000000e+00> : vector<8x512xf32>
    %10 = tpu.matmul %8, %9, %cst_8 {dimension_numbers = #tpu.dot_dimension_numbers<[1], [0], [0], [1], [0, 0, 1, 1], [], []>} : vector<8x16xbf16>, vector<16x512xbf16>, vector<8x512xf32> -> vector<8x512xf32>
    %11 = arith.addf %7, %10 : vector<8x512xf32>
    %c0_9 = arith.constant 0 : index
    %c0_10 = arith.constant 0 : index
    %12 = vector.load %arg5[%c0_9, %c0_10] : memref<8x512xf32, #tpu.memory_space<vmem>>, vector<8x512xf32>
    tpu.vector_store %arg5[%c0_9, %c0_10], %11 {strides = array<i32>} : memref<8x512xf32, #tpu.memory_space<vmem>>, vector<8x512xf32>,
    %c0_11 = arith.constant 0 : index
    %c0_12 = arith.constant 0 : index
    %13 = vector.load %arg6[%c0_11, %c0_12] : memref<8x512xf32, #tpu.memory_space<vmem>>, vector<8x512xf32>
    tpu.vector_store %arg6[%c0_11, %c0_12], %3 {strides = array<i32>} : memref<8x512xf32, #tpu.memory_space<vmem>>, vector<8x512xf32>,
    return
  }
  func.func @transform_0(%arg0: i32) -> (i32, i32) {
    %c0_i32 = arith.constant 0 : i32
    %c0_i32_0 = arith.constant 0 : i32
    return %c0_i32, %arg0 : i32, i32
  }
  func.func @transform_1(%arg0: i32) -> (i32, i32) {
    %c0_i32 = arith.constant 0 : i32
    %c0_i32_0 = arith.constant 0 : i32
    return %c0_i32, %arg0 : i32, i32
  }
  func.func @transform_2(%arg0: i32) -> (i32, i32) {
    %c0_i32 = arith.constant 0 : i32
    %c0_i32_0 = arith.constant 0 : i32
    %c0_i32_1 = arith.constant 0 : i32
    return %c0_i32, %c0_i32_0 : i32, i32
  }
  func.func @transform_3(%arg0: i32) -> (i32, i32) {
    %c0_i32 = arith.constant 0 : i32
    %c0_i32_0 = arith.constant 0 : i32
    %c0_i32_1 = arith.constant 0 : i32
    return %c0_i32, %c0_i32_0 : i32, i32
  }
  func.func @transform_4(%arg0: i32) -> (i32, i32) {
    %c0_i32 = arith.constant 0 : i32
    %c0_i32_0 = arith.constant 0 : i32
    return %c0_i32, %arg0 : i32, i32
  }
  func.func @transform_5(%arg0: i32) -> (i32, i32) {
    %c0_i32 = arith.constant 0 : i32
    %c0_i32_0 = arith.constant 0 : i32
    return %c0_i32, %arg0 : i32, i32
  }
}

</mosaic_0001>

<bundles_post_ra>
// kernel: mlp_block_pallas.1
= control target key start
LH: loop header
LB: loop body
LE: loop exit
PB: predicated region body
PF: predicated region fallthrough
CT: control target
= control target key end

     0   :  { %vm130_vm0 = vcmask 1045504   ;;  %vm131_vm1 = vcmask 1046528   ;;  %v409_v2 = vmov 65535   ;;  %vm123_vm2 = vcmask 498688   ;;  %s585_s0 = inlined_call_operand.vmem [shape: bf16[61,512], index: 0, kind: input, shape index: {}]   ;;  %s586_s2 = inlined_call_operand.vmem [shape: bf16[24,61], index: 2, kind: input, shape index: {}]   ;;  %s587_s5 = inlined_call_operand.vmem [shape: f32[8,512], index: 5, kind: output, shape index: {1}]   ;;  %s588_s3 = inlined_call_operand.vmem [shape: bf16[8,16], index: 3, kind: input, shape index: {}]   ;;  %s589_s1 = inlined_call_operand.vmem [shape: f32[8,512], index: 1, kind: input, shape index: {}]   ;;  %s590_s4 = inlined_call_operand.vmem [shape: f32[8,512], index: 4, kind: output, shape index: {0}]  }
   0x1   :  { %v365_v0 = vld [vmem:[%s585_s0 + $0x60] sm:$0xf]  ;;  %v405_v1 = vld [vmem:[%s585_s0 + $0x6c] sm:$0x70]  ;;  %v132_v3 = vsel %vm130_vm0, 4294967295, %v409_v2  ;;  %vm235_vm3 = vcmask 130048  }
   0x2   :  { %v366_v4 = vor.u32 %v405_v1, %v365_v0  ;;  %v133_v5 = vsel %vm131_vm1, %v132_v3, 0  ;;  %v403_v6 = vld [vmem:[%s585_s0 + $0x64] sm:$0xf]  ;;  %v367_v7 = vld [vmem:[%s585_s0 + $0x70] sm:$0x70] }
   0x3   :  { %v370_v8 = vor.u32 %v403_v6, %v367_v7  ;;  %v373_v9 = vld [vmem:[%s585_s0 + $0x68] sm:$0xf]  ;;  %v406_v10 = vld [vmem:[%s585_s0 + $0x74] sm:$0x70]  ;;  %v404_v11 = vld [vmem:[%s585_s0 + $0x6c] sm:$0xf] }
   0x4   :  { %v135_v12 = vand.u32 %v366_v4, %v133_v5  ;;  %v374_v13 = vor.u32 %v406_v10, %v373_v9  ;;  %v375_v14 = vld [vmem:[%s585_s0 + $0x78] sm:$0x70]  ;;  %v349_v15 = vld [vmem:[%s585_s0 + $0x40] sm:$0xf]  ;;  %v401_v16 = vld [vmem:[%s585_s0 + $0x4c] sm:$0xf0] }
   0x5   :  { %v138_v17 = vand.u32 %v370_v8, %v133_v5  ;;  %v378_v18 = vor.u32 %v404_v11, %v375_v14  ;;  %v399_v19 = vld [vmem:[%s585_s0 + $0x44] sm:$0xf]  ;;  %v351_v20 = vld [vmem:[%s585_s0 + $0x50] sm:$0xf0]  ;;  %v357_v21 = vld [vmem:[%s585_s0 + $0x48] sm:$0xf]  ;;  %v350_v23 = vor.u32 %v401_v16, %v349_v15 }
   0x6   :  { %150 = vmatpush.bf16.msra.mxu0 %v135_v12  ;;  %v141_v22 = vand.u32 %v374_v13, %v133_v5  ;;  %v402_v24 = vld [vmem:[%s585_s0 + $0x54] sm:$0xf0]  ;;  %v400_v25 = vld [vmem:[%s585_s0 + $0x4c] sm:$0xf]  ;;  %v359_v26 = vld [vmem:[%s585_s0 + $0x58] sm:$0xf0]  ;;  %v354_v28 = vor.u32 %v399_v19, %v351_v20 }
   0x7   :  { %168 = vmatpush.bf16.msra.mxu1 %v138_v17  ;;  %v144_v27 = vand.u32 %v378_v18, %v133_v5  ;;  %v333_v29 = vld [vmem:[%s585_s0 + $0x20] sm:$0xf]  ;;  %v397_v30 = vld [vmem:[%s585_s0 + $0x2c] sm:$0xf0]  ;;  %v358_v31 = vor.u32 %v402_v24, %v357_v21  ;;  %v395_v32 = vld [vmem:[%s585_s0 + $0x24] sm:$0xf]  ;;  %v362_v34 = vor.u32 %v400_v25, %v359_v26 }
   0x8   :  { %186 = vmatpush.bf16.msra.mxu2 %v141_v22  ;;  %v335_v33 = vld [vmem:[%s585_s0 + $0x30] sm:$0xf0]  ;;  %v341_v35 = vld [vmem:[%s585_s0 + $0x28] sm:$0xf]  ;;  %v398_v36 = vld [vmem:[%s585_s0 + $0x34] sm:$0xf0]  ;;  %v334_v37 = vor.u32 %v397_v30, %v333_v29 }
   0x9   :  { %204 = vmatpush.bf16.msra.mxu3 %v144_v27  ;;  %v396_v38 = vld [vmem:[%s585_s0 + $0x2c] sm:$0xf]  ;;  %v343_v39 = vld [vmem:[%s585_s0 + $0x38] sm:$0xf0]  ;;  %v338_v40 = vor.u32 %v395_v32, %v335_v33  ;;  %v317_v41 = vld [vmem:[%s585_s0] sm:$0xf]  ;;  %v342_v43 = vor.u32 %v398_v36, %v341_v35 }
   0xa   :  { %151 = vmatpush.bf16.msra.mxu0 %v350_v23  ;;  %v393_v42 = vld [vmem:[%s585_s0 + $0xc] sm:$0xf0]  ;;  %v391_v44 = vld [vmem:[%s585_s0 + $0x4] sm:$0xf]  ;;  %v319_v45 = vld [vmem:[%s585_s0 + $0x10] sm:$0xf0]  ;;  %v346_v46 = vor.u32 %v396_v38, %v343_v39 }
   0xb   :  { %169 = vmatpush.bf16.msra.mxu1 %v354_v28  ;;  %v325_v47 = vld [vmem:[%s585_s0 + $0x8] sm:$0xf]  ;;  %v394_v48 = vld [vmem:[%s585_s0 + $0x14] sm:$0xf0]  ;;  %v318_v49 = vor.u32 %v393_v42, %v317_v41  ;;  %v392_v50 = vld [vmem:[%s585_s0 + $0xc] sm:$0xf]  ;;  %v322_v52 = vor.u32 %v391_v44, %v319_v45 }
   0xc   :  { %187 = vmatpush.bf16.msra.mxu2 %v358_v31  ;;  %v327_v51 = vld [vmem:[%s585_s0 + $0x18] sm:$0xf0]  ;;  %v326_v53 = vor.u32 %v394_v48, %v325_v47  ;;  %v407_v55 = vld [vmem:[%s586_s2] sm:$0xff]  ;;  %v38_v56 = vld [vmem:[%s586_s2 + $0x8] sm:$0xf] }
   0xd   :  { %205 = vmatpush.bf16.msra.mxu3 %v362_v34  ;;  %v330_v54 = vor.u32 %v392_v50, %v327_v51  ;;  %v44_v57 = vunpack.c.l.b16 %v38_v56  ;;  %v230_v11 = vld [vmem:[%s588_s3] sm:$0xf]  ;;  %v227_v25 = vld [vmem:[%s589_s1 + $0x8] sm:$0xff]  ;;  %v228_v32 = vld [vmem:[%s589_s1 + $0x10] sm:$0xff] }
   0xe   :  { %152 = vmatpush.bf16.msra.mxu0 %v334_v37  ;;  %v226_v24 = vld [vmem:[%s589_s1] sm:$0xff]  ;;  %v229_v33 = vld [vmem:[%s589_s1 + $0x18] sm:$0xff] }
   0xf   :  { %170 = vmatpush.bf16.msra.mxu1 %v338_v40  ;;  %v46_v58 = vpack.c.b16 %v44_v57, %v44_v57 }
  0x10   :  { %188 = vmatpush.bf16.msra.mxu2 %v342_v43 }
  0x11   :  { %206 = vmatpush.bf16.msra.mxu3 %v346_v46 }
  0x12   :  { %153 = vmatpush.bf16.msra.mxu0 %v318_v49 }
  0x13   :  { %171 = vmatpush.bf16.msra.mxu1 %v322_v52 }
  0x14   :  { %189 = vmatpush.bf16.msra.mxu2 %v326_v53 }
  0x15   :  { %207 = vmatpush.bf16.msra.mxu3 %v330_v54  ;;  %379 = vmatmul.msk.bf16.vlgmr.msra.gmra.mxu0 %vm123_vm2, %v407_v55 }
  0x16   :  { %381 = vmatmul.msk.bf16.vlgmr.msra.gmra.mxu1 %vm123_vm2, %v407_v55 }
  0x17   :  { %383 = vmatmul.msk.bf16.vlgmr.msra.gmra.mxu2 %vm123_vm2, %v407_v55 }
  0x18   :  { %385 = vmatmul.msk.bf16.vlgmr.msra.gmra.mxu3 %vm123_vm2, %v407_v55 }
  0x25   :  { %380 = vmatmul.msk.bf16.gmra.mxu0 %vm123_vm2, %v46_v58 }
  0x26   :  { %382 = vmatmul.msk.bf16.gmra.mxu1 %vm123_vm2, %v46_v58 }
  0x27   :  { %384 = vmatmul.msk.bf16.gmra.mxu2 %vm123_vm2, %v46_v58 }
  0x28   :  { %386 = vmatmul.msk.bf16.gmra.mxu3 %vm123_vm2, %v46_v58 }
  0x92   :  { %v155_v59 = vpop.f32.mrf.mxu0 }
  0x93   :  { %299 = vst [vmem:[%s587_s5] sm:$0xff] %v155_v59  ;;  %v173_v60 = vpop.f32.mrf.mxu1 }
  0x94   :  { %300 = vst [vmem:[%s587_s5 + $0x8] sm:$0xff] %v173_v60 }
  0x9a   :  { %v191_v61 = vpop.f32.mrf.mxu2  ;;  %v157_v62 = vpop.f32.mrf.mxu0 }
  0x9b   :  { %301 = vst [vmem:[%s587_s5 + $0x10] sm:$0xff] %v191_v61  ;;  %v209_v63 = vpop.f32.mrf.mxu3  ;;  %v175_v0 = vpop.f32.mrf.mxu1  ;;  %v218_v3 = vmax.f32 %v157_v62, 0.0 }
  0x9c   :  { %302 = vst [vmem:[%s587_s5 + $0x18] sm:$0xff] %v209_v63  ;;  %v219_v7 = vmax.f32 %v175_v0, 0.0 }
  0xa2   :  { %v193_v1 = vpop.f32.mrf.mxu2  ;;  %v160_v2 = vpop.f32.mrf.mxu0 }
  0xa3   :  { %v211_v4 = vpop.f32.mrf.mxu3  ;;  %v222_v5 = vmax.f32 %v160_v2, 0.0  ;;  %v178_v6 = vpop.f32.mrf.mxu1  ;;  %v220_v14 = vmax.f32 %v193_v1, 0.0 }
  0xa4   :  { %v223_v8 = vmax.f32 %v178_v6, 0.0  ;;  %v221_v18 = vmax.f32 %v211_v4, 0.0 }
  0xa5   :  { %v231_v9 = vpack.c.bf16 %v222_v5, %v218_v3 }
  0xa6   :  { %v232_v10 = vpack.c.bf16 %v223_v8, %v219_v7 }
  0xa7   :  { %246 = vmatpush.bf16.msrb.mxu0 %v231_v9 }
  0xa8   :  { %259 = vmatpush.bf16.msrb.mxu1 %v232_v10 }
  0xaa   :  { %v196_v12 = vpop.f32.mrf.mxu2  ;;  %v162_v13 = vpop.f32.mrf.mxu0  ;;  %387 = vmatmul.msk.bf16.vlgmr.msrb.gmra.mxu0 %vm235_vm3, %v230_v11 }
  0xab   :  { %v224_v15 = vmax.f32 %v196_v12, 0.0  ;;  %v214_v16 = vpop.f32.mrf.mxu3  ;;  %v180_v17 = vpop.f32.mrf.mxu1  ;;  %388 = vmatmul.msk.bf16.vlgmr.msrb.gmra.mxu1 %vm235_vm3, %v230_v11 }
  0xac   :  { %v225_v19 = vmax.f32 %v214_v16, 0.0 }
  0xad   :  { %v233_v20 = vpack.c.bf16 %v224_v15, %v220_v14 }
  0xae   :  { %v234_v21 = vpack.c.bf16 %v225_v19, %v221_v18 }
  0xaf   :  { %272 = vmatpush.bf16.msrb.mxu2 %v233_v20 }
  0xb0   :  { %285 = vmatpush.bf16.msrb.mxu3 %v234_v21 }
  0xb2   :  { %v198_v22 = vpop.f32.mrf.mxu2  ;;  %389 = vmatmul.msk.bf16.vlgmr.msrb.gmra.mxu2 %vm235_vm3, %v230_v11 }
  0xb3   :  { %v216_v23 = vpop.f32.mrf.mxu3  ;;  %390 = vmatmul.msk.bf16.vlgmr.msrb.gmra.mxu3 %vm235_vm3, %v230_v11 }
 0x127   :  { %v248_v26 = vpop.f32.mrf.mxu0 }
 0x128   :  { %v291_v27 = vadd.f32 %v248_v26, %v226_v24  ;;  %v261_v28 = vpop.f32.mrf.mxu1 }
 0x129   :  { %v292_v29 = vadd.f32 %v261_v28, %v227_v25 }
 0x12a   :  { %295 = vst [vmem:[%s590_s4] sm:$0xff] %v291_v27 }
 0x12b   :  { %296 = vst [vmem:[%s590_s4 + $0x8] sm:$0xff] %v292_v29 }
 0x12f   :  { %v250_v30 = vpop.f32.mrf.mxu0 }
 0x130   :  { %v263_v31 = vpop.f32.mrf.mxu1 }
 0x135   :  { %v274_v34 = vpop.f32.mrf.mxu2 }
 0x136   :  { %v293_v35 = vadd.f32 %v274_v34, %v228_v32  ;;  %v287_v36 = vpop.f32.mrf.mxu3 }
 0x137   :  { %v294_v37 = vadd.f32 %v287_v36, %v229_v33 }
 0x138   :  { %297 = vst [vmem:[%s590_s4 + $0x10] sm:$0xff] %v293_v35 }
 0x139   :  { %298 = vst [vmem:[%s590_s4 + $0x18] sm:$0xff] %v294_v37 }
 0x13d   :  { %v276_v38 = vpop.f32.mrf.mxu2 }
 0x13e   :  { %v289_v39 = vpop.f32.mrf.mxu3 }

</bundles_post_ra>
